<compile_context>
chip_gen: v5e
topology: v5e:2x2
jax: 0.10.0
libtpu: 0.0.40
codegen_flags: <defaults>
</compile_context>

<pallas_src>
import functools

import jax
import jax.numpy as jnp
from jax.experimental import pallas as pl
from jax.experimental.pallas import tpu as pltpu

_LANE = 128   # feature slabs padded to multiples of this (lane-dense matmuls/stores)
_ROW = 16     # node-count row padding (bf16 packs 16 rows per vreg)


def _round_up(n, m):
    return (n + m - 1) // m * m


def _graphsage_fused_kernel(adj0_ref, adj1_ref, x_ref,
                            wn1_ref, ws1_ref, b1_ref,
                            wn2_ref, ws2_ref, b2_ref, o_ref):
    f32, bf16 = jnp.float32, jnp.bfloat16

    adj0 = adj0_ref[...]                           # [d0p, s0p] bf16, exact 0/1
    adj1 = adj1_ref[...]                           # [d1p, d0p] bf16, exact 0/1
    x = x_ref[...]                                 # [s0p, f_in] bf16
    n_dst0p = adj0.shape[0]
    n_dst1p = adj1.shape[0]

    # Mean-aggregation scales: exact integer row sums (0/1 entries), clamped so zero-degree
    # (padded / isolated) rows aggregate to 0, matching DGL's mean aggregator.
    deg0 = jnp.maximum(jnp.sum(adj0.astype(f32), axis=-1, keepdims=True), 1.0)
    deg1 = jnp.maximum(jnp.sum(adj1.astype(f32), axis=-1, keepdims=True), 1.0)
    inv0 = pl.reciprocal(deg0, approx=True)        # EUP slot, ~free
    inv1 = pl.reciprocal(deg1, approx=True)

    # ---- layer 1: h = relu(x_dst @ Wself1 + mean_neigh(x) @ Wneigh1 + b1) -----------------
    xw_n1 = jnp.dot(x, wn1_ref[...], preferred_element_type=f32)               # [s0p, hp]
    self1 = jnp.dot(x[:n_dst0p, :], ws1_ref[...], preferred_element_type=f32)  # [d0p, hp]
    neigh1 = jnp.dot(adj0, xw_n1.astype(bf16), preferred_element_type=f32) * inv0
    h = jnp.maximum(self1 + neigh1 + b1_ref[...], 0.0)                         # [d0p, hp] f32
    h_bf = h.astype(bf16)                          # stays resident in VMEM/vregs

    # ---- layer 2: out = h_dst @ Wself2 + mean_neigh(h) @ Wneigh2 + b2 ----------------------
    hw_n2 = jnp.dot(h_bf, wn2_ref[...], preferred_element_type=f32)               # [d0p, cp]
    self2 = jnp.dot(h_bf[:n_dst1p, :], ws2_ref[...], preferred_element_type=f32)  # [d1p, cp]
    neigh2 = jnp.dot(adj1, hw_n2.astype(bf16), preferred_element_type=f32) * inv1
    o_ref[...] = (self2 + neigh2 + b2_ref[...]).astype(o_ref.dtype)               # 128-lane vst


def prepare_params(params):
    """Pad weights/biases to lane-dense slabs and cast matmul operands to bf16.

    Call ONCE at parameter-load time (hoisted off the per-forward dispatch path)."""
    f_in, h_feats = params["w_self1"].shape
    num_classes = params["w_self2"].shape[1]
    hp = _round_up(h_feats, _LANE)
    cp = _round_up(num_classes, _LANE)

    def pad_w(w, rows, cols):
        out = jnp.zeros((rows, cols), jnp.float32).at[:w.shape[0], :w.shape[1]].set(w)
        return out.astype(jnp.bfloat16)

    def pad_b(b, cols):
        return jnp.zeros((1, cols), jnp.float32).at[0, :b.shape[0]].set(b)

    return {
        "wn1": pad_w(params["w_neigh1"], f_in, hp),
        "ws1": pad_w(params["w_self1"], f_in, hp),
        "b1": pad_b(params["b1"], hp),
        "wn2": pad_w(params["w_neigh2"], hp, cp),
        "ws2": pad_w(params["w_self2"], hp, cp),
        "b2": pad_b(params["b2"], cp),
    }


def graphsage_forward(adj0, adj1, x, prep, *, num_classes):
    """Batched 2-layer GraphSAGE forward (Model.forward over B minibatches).

    adj0: [B, n_dst0, n_src0] 0/1 adjacency of MFG 0
    adj1: [B, n_dst1, n_dst0] 0/1 adjacency of MFG 1
    x:    [B, n_src0, f_in]   src-node features
    prep: output of prepare_params()
    Precondition (MFG convention): dst nodes are the first n_dst rows of the src nodes.
    """
    B, n_dst0, n_src0 = adj0.shape
    n_dst1 = adj1.shape[1]
    f_in = x.shape[-1]
    assert n_dst1 <= n_dst0 <= n_src0, "MFG convention: dst nodes are a prefix of src nodes"

    hp = prep["wn1"].shape[1]
    cp = prep["wn2"].shape[1]
    s0p = _round_up(n_src0, _ROW)
    d0p = _round_up(n_dst0, _ROW)
    d1p = _round_up(n_dst1, _ROW)

    def pad3(a, rows, cols):
        a = a.astype(jnp.bfloat16)
        pr, pc = rows - a.shape[1], cols - a.shape[2]
        return jnp.pad(a, ((0, 0), (0, pr), (0, pc))) if (pr or pc) else a

    adj0_b = pad3(adj0, d0p, s0p)
    adj1_b = pad3(adj1, d1p, d0p)
    x_b = pad3(x, s0p, f_in)

    batched = lambda shape: pl.BlockSpec((None,) + shape[1:], lambda b: (b, 0, 0))
    shared = lambda shape: pl.BlockSpec(shape, lambda b: (0, 0))

    out = pl.pallas_call(
        _graphsage_fused_kernel,
        out_shape=jax.ShapeDtypeStruct((B, d1p, cp), jnp.float32),
        grid=(B,),
        in_specs=[
            batched(adj0_b.shape), batched(adj1_b.shape), batched(x_b.shape),
            shared(prep["wn1"].shape), shared(prep["ws1"].shape), shared(prep["b1"].shape),
            shared(prep["wn2"].shape), shared(prep["ws2"].shape), shared(prep["b2"].shape),
        ],
        out_specs=pl.BlockSpec((None, d1p, cp), lambda b: (b, 0, 0)),
        compiler_params=pltpu.CompilerParams(
            dimension_semantics=("parallel",)),   # minibatch axis: shards across v7x's 2 TCs
    )(adj0_b, adj1_b, x_b,
      prep["wn1"], prep["ws1"], prep["b1"], prep["wn2"], prep["ws2"], prep["b2"])

    # Slice padded rows/lanes off OUTSIDE the kernel (keeps the in-kernel store lane-dense).
    return out[:, :n_dst1, :num_classes]


if __name__ == "__main__":
    in_feats, h_feats, num_classes = 16, 32, 8
    B = 2                                   # two MFG minibatches batched into one pallas_call
    n_src0, n_dst0, n_dst1 = 60, 28, 12     # deliberately not multiples of 16 (exercise padding)

    key = jax.random.PRNGKey(0)
    k_x, k_a0, k_a1, k_w1s, k_w1n, k_w2s, k_w2n = jax.random.split(key, 7)

    def make_adj(k, nd, ns, p=0.3):
        a = jax.random.bernoulli(k, p, (nd, ns)).astype(jnp.float32)
        eye = jnp.zeros((nd, ns)).at[jnp.arange(nd), jnp.arange(nd)].set(1.0)
        return jnp.maximum(a, eye)          # 0/1 adjacency, self edge guaranteed

    x = jax.random.normal(k_x, (B, n_src0, in_feats), dtype=jnp.float32)
    adj0 = jnp.stack([make_adj(k, n_dst0, n_src0) for k in jax.random.split(k_a0, B)])
    adj1 = jnp.stack([make_adj(k, n_dst1, n_dst0) for k in jax.random.split(k_a1, B)])

    def glorot(k, shape):
        return jax.random.normal(k, shape, jnp.float32) * jnp.sqrt(2.0 / (shape[0] + shape[1]))

    params = {
        "w_self1": glorot(k_w1s, (in_feats, h_feats)),
        "w_neigh1": glorot(k_w1n, (in_feats, h_feats)),
        "b1": jnp.zeros((h_feats,), jnp.float32),
        "w_self2": glorot(k_w2s, (h_feats, num_classes)),
        "w_neigh2": glorot(k_w2n, (h_feats, num_classes)),
        "b2": jnp.zeros((num_classes,), jnp.float32),
    }

    prep = prepare_params(params)           # hoisted: done once at parameter-load time
    fwd = jax.jit(functools.partial(graphsage_forward, num_classes=num_classes))
    out = fwd(adj0, adj1, x, prep)
    jax.block_until_ready(out)
    assert out.shape == (B, n_dst1, num_classes)

    # Pure-JAX f32 reference of the module semantics.
    def ref_one(a0, a1, xs, p):
        def layer(adj, src, dst, ws, wn, b, relu):
            mean = (adj @ src) / jnp.sum(adj, axis=1, keepdims=True)
            o = dst @ ws + mean @ wn + b
            return jnp.maximum(o, 0.0) if relu else o
        h = layer(a0, xs, xs[:a0.shape[0]], p["w_self1"], p["w_neigh1"], p["b1"], True)
        return layer(a1, h, h[:a1.shape[0]], p["w_self2"], p["w_neigh2"], p["b2"], False)

    o_ref = jax.vmap(lambda a0, a1, xs: ref_one(a0, a1, xs, params))(adj0, adj1, x)
    max_err = float(jnp.max(jnp.abs(out - o_ref)))
    # bf16 feature/weight MXU path (f32 accumulation) with exact 0/1 adjacency + f32 1/deg scale
    assert jnp.allclose(out, o_ref, atol=3e-2, rtol=3e-2), max_err

    print("KERNEL_OK")
</pallas_src>

<mosaic_0001>
module attributes {stable_mosaic.version = 11 : i64} {
  func.func @_graphsage_fused_kernel(%arg0: i32, %arg1: memref<1x32x64xbf16, #tpu.memory_space<vmem>>, %arg2: memref<1x16x32xbf16, #tpu.memory_space<vmem>>, %arg3: memref<1x64x16xbf16, #tpu.memory_space<vmem>>, %arg4: memref<16x128xbf16, #tpu.memory_space<vmem>>, %arg5: memref<16x128xbf16, #tpu.memory_space<vmem>>, %arg6: memref<1x128xf32, #tpu.memory_space<vmem>>, %arg7: memref<128x128xbf16, #tpu.memory_space<vmem>>, %arg8: memref<128x128xbf16, #tpu.memory_space<vmem>>, %arg9: memref<1x128xf32, #tpu.memory_space<vmem>>, %arg10: memref<1x16x128xf32, #tpu.memory_space<vmem>>) attributes {dimension_semantics = [#tpu.dimension_semantics<parallel>], iteration_bounds = array<i64: 2>, scalar_prefetch = 0 : i64, scratch_operands = 0 : i64, tpu.core_type = #tpu.core_type<tc>, window_params = [{transform_indices = @transform_0, window_bounds = array<i64: 1, 32, 64>}, {transform_indices = @transform_1, window_bounds = array<i64: 1, 16, 32>}, {transform_indices = @transform_2, window_bounds = array<i64: 1, 64, 16>}, {pipeline_mode = #tpu.pipeline_mode<synchronous>, transform_indices = @transform_3, window_bounds = array<i64: 16, 128>}, {pipeline_mode = #tpu.pipeline_mode<synchronous>, transform_indices = @transform_4, window_bounds = array<i64: 16, 128>}, {pipeline_mode = #tpu.pipeline_mode<synchronous>, transform_indices = @transform_5, window_bounds = array<i64: 1, 128>}, {pipeline_mode = #tpu.pipeline_mode<synchronous>, transform_indices = @transform_6, window_bounds = array<i64: 128, 128>}, {pipeline_mode = #tpu.pipeline_mode<synchronous>, transform_indices = @transform_7, window_bounds = array<i64: 128, 128>}, {pipeline_mode = #tpu.pipeline_mode<synchronous>, transform_indices = @transform_8, window_bounds = array<i64: 1, 128>}, {transform_indices = @transform_9, window_bounds = array<i64: 1, 16, 128>}]} {
    %c0 = arith.constant 0 : index
    %c0_0 = arith.constant 0 : index
    %c0_1 = arith.constant 0 : index
    %0 = vector.load %arg1[%c0, %c0_0, %c0_1] : memref<1x32x64xbf16, #tpu.memory_space<vmem>>, vector<1x32x64xbf16>
    %1 = vector.shape_cast %0 : vector<1x32x64xbf16> to vector<32x64xbf16>
    %c0_2 = arith.constant 0 : index
    %c0_3 = arith.constant 0 : index
    %c0_4 = arith.constant 0 : index
    %2 = vector.load %arg2[%c0_2, %c0_3, %c0_4] : memref<1x16x32xbf16, #tpu.memory_space<vmem>>, vector<1x16x32xbf16>
    %3 = vector.shape_cast %2 : vector<1x16x32xbf16> to vector<16x32xbf16>
    %c0_5 = arith.constant 0 : index
    %c0_6 = arith.constant 0 : index
    %c0_7 = arith.constant 0 : index
    %4 = vector.load %arg3[%c0_5, %c0_6, %c0_7] : memref<1x64x16xbf16, #tpu.memory_space<vmem>>, vector<1x64x16xbf16>
    %5 = vector.shape_cast %4 : vector<1x64x16xbf16> to vector<64x16xbf16>
    %6 = arith.extf %1 : vector<32x64xbf16> to vector<32x64xf32>
    %cst = arith.constant dense<0.000000e+00> : vector<32xf32>
    %7 = vector.multi_reduction <add>, %6, %cst [1] : vector<32x64xf32> to vector<32xf32>
    %8 = vector.shape_cast %7 : vector<32xf32> to vector<32x1xf32>
    %cst_8 = arith.constant 1.000000e+00 : f32
    %9 = vector.broadcast %cst_8 : f32 to vector<32x1xf32>
    %10 = arith.maximumf %8, %9 : vector<32x1xf32>
    %11 = arith.extf %3 : vector<16x32xbf16> to vector<16x32xf32>
    %cst_9 = arith.constant dense<0.000000e+00> : vector<16xf32>
    %12 = vector.multi_reduction <add>, %11, %cst_9 [1] : vector<16x32xf32> to vector<16xf32>
    %13 = vector.shape_cast %12 : vector<16xf32> to vector<16x1xf32>
    %cst_10 = arith.constant 1.000000e+00 : f32
    %14 = vector.broadcast %cst_10 : f32 to vector<16x1xf32>
    %15 = arith.maximumf %13, %14 : vector<16x1xf32>
    %16 = tpu.reciprocal %10 {approx = true} : vector<32x1xf32> -> vector<32x1xf32>
    %17 = tpu.reciprocal %15 {approx = true} : vector<16x1xf32> -> vector<16x1xf32>
    %c0_11 = arith.constant 0 : index
    %c0_12 = arith.constant 0 : index
    %18 = vector.load %arg4[%c0_11, %c0_12] : memref<16x128xbf16, #tpu.memory_space<vmem>>, vector<16x128xbf16>
    %cst_13 = arith.constant dense<0.000000e+00> : vector<64x128xf32>
    %19 = tpu.matmul %5, %18, %cst_13 {dimension_numbers = #tpu.dot_dimension_numbers<[1], [0], [0], [1], [0, 0, 1, 1], [], []>} : vector<64x16xbf16>, vector<16x128xbf16>, vector<64x128xf32> -> vector<64x128xf32>
    %20 = vector.extract_strided_slice %5 {offsets = [0, 0], sizes = [32, 16], strides = [1, 1]} : vector<64x16xbf16> to vector<32x16xbf16>
    %c0_14 = arith.constant 0 : index
    %c0_15 = arith.constant 0 : index
    %21 = vector.load %arg5[%c0_14, %c0_15] : memref<16x128xbf16, #tpu.memory_space<vmem>>, vector<16x128xbf16>
    %cst_16 = arith.constant dense<0.000000e+00> : vector<32x128xf32>
    %22 = tpu.matmul %20, %21, %cst_16 {dimension_numbers = #tpu.dot_dimension_numbers<[1], [0], [0], [1], [0, 0, 1, 1], [], []>} : vector<32x16xbf16>, vector<16x128xbf16>, vector<32x128xf32> -> vector<32x128xf32>
    %23 = arith.truncf %19 : vector<64x128xf32> to vector<64x128xbf16>
    %cst_17 = arith.constant dense<0.000000e+00> : vector<32x128xf32>
    %24 = tpu.matmul %1, %23, %cst_17 {dimension_numbers = #tpu.dot_dimension_numbers<[1], [0], [0], [1], [0, 0, 1, 1], [], []>} : vector<32x64xbf16>, vector<64x128xbf16>, vector<32x128xf32> -> vector<32x128xf32>
    %25 = vector.broadcast %16 : vector<32x1xf32> to vector<32x128xf32>
    %26 = arith.mulf %24, %25 : vector<32x128xf32>
    %27 = arith.addf %22, %26 : vector<32x128xf32>
    %c0_18 = arith.constant 0 : index
    %c0_19 = arith.constant 0 : index
    %28 = vector.load %arg6[%c0_18, %c0_19] : memref<1x128xf32, #tpu.memory_space<vmem>>, vector<1x128xf32>
    %29 = vector.broadcast %28 : vector<1x128xf32> to vector<32x128xf32>
    %30 = arith.addf %27, %29 : vector<32x128xf32>
    %cst_20 = arith.constant 0.000000e+00 : f32
    %31 = vector.broadcast %cst_20 : f32 to vector<32x128xf32>
    %32 = arith.maximumf %30, %31 : vector<32x128xf32>
    %33 = arith.truncf %32 : vector<32x128xf32> to vector<32x128xbf16>
    %c0_21 = arith.constant 0 : index
    %c0_22 = arith.constant 0 : index
    %34 = vector.load %arg7[%c0_21, %c0_22] : memref<128x128xbf16, #tpu.memory_space<vmem>>, vector<128x128xbf16>
    %cst_23 = arith.constant dense<0.000000e+00> : vector<32x128xf32>
    %35 = tpu.matmul %33, %34, %cst_23 {dimension_numbers = #tpu.dot_dimension_numbers<[1], [0], [0], [1], [0, 0, 1, 1], [], []>} : vector<32x128xbf16>, vector<128x128xbf16>, vector<32x128xf32> -> vector<32x128xf32>
    %36 = vector.extract_strided_slice %33 {offsets = [0, 0], sizes = [16, 128], strides = [1, 1]} : vector<32x128xbf16> to vector<16x128xbf16>
    %c0_24 = arith.constant 0 : index
    %c0_25 = arith.constant 0 : index
    %37 = vector.load %arg8[%c0_24, %c0_25] : memref<128x128xbf16, #tpu.memory_space<vmem>>, vector<128x128xbf16>
    %cst_26 = arith.constant dense<0.000000e+00> : vector<16x128xf32>
    %38 = tpu.matmul %36, %37, %cst_26 {dimension_numbers = #tpu.dot_dimension_numbers<[1], [0], [0], [1], [0, 0, 1, 1], [], []>} : vector<16x128xbf16>, vector<128x128xbf16>, vector<16x128xf32> -> vector<16x128xf32>
    %39 = arith.truncf %35 : vector<32x128xf32> to vector<32x128xbf16>
    %cst_27 = arith.constant dense<0.000000e+00> : vector<16x128xf32>
    %40 = tpu.matmul %3, %39, %cst_27 {dimension_numbers = #tpu.dot_dimension_numbers<[1], [0], [0], [1], [0, 0, 1, 1], [], []>} : vector<16x32xbf16>, vector<32x128xbf16>, vector<16x128xf32> -> vector<16x128xf32>
    %41 = vector.broadcast %17 : vector<16x1xf32> to vector<16x128xf32>
    %42 = arith.mulf %40, %41 : vector<16x128xf32>
    %43 = arith.addf %38, %42 : vector<16x128xf32>
    %c0_28 = arith.constant 0 : index
    %c0_29 = arith.constant 0 : index
    %44 = vector.load %arg9[%c0_28, %c0_29] : memref<1x128xf32, #tpu.memory_space<vmem>>, vector<1x128xf32>
    %45 = vector.broadcast %44 : vector<1x128xf32> to vector<16x128xf32>
    %46 = arith.addf %43, %45 : vector<16x128xf32>
    %c0_30 = arith.constant 0 : index
    %c0_31 = arith.constant 0 : index
    %c0_32 = arith.constant 0 : index
    %47 = vector.load %arg10[%c0_30, %c0_31, %c0_32] : memref<1x16x128xf32, #tpu.memory_space<vmem>>, vector<1x16x128xf32>
    %48 = vector.shape_cast %47 : vector<1x16x128xf32> to vector<16x128xf32>
    %49 = vector.shape_cast %46 : vector<16x128xf32> to vector<1x16x128xf32>
    tpu.vector_store %arg10[%c0_30, %c0_31, %c0_32], %49 {strides = array<i32>} : memref<1x16x128xf32, #tpu.memory_space<vmem>>, vector<1x16x128xf32>,
    return
  }
  func.func @transform_0(%arg0: i32) -> (i32, i32, i32) {
    %c0_i32 = arith.constant 0 : i32
    %c0_i32_0 = arith.constant 0 : i32
    %c0_i32_1 = arith.constant 0 : i32
    return %arg0, %c0_i32, %c0_i32_0 : i32, i32, i32
  }
  func.func @transform_1(%arg0: i32) -> (i32, i32, i32) {
    %c0_i32 = arith.constant 0 : i32
    %c0_i32_0 = arith.constant 0 : i32
    %c0_i32_1 = arith.constant 0 : i32
    return %arg0, %c0_i32, %c0_i32_0 : i32, i32, i32
  }
  func.func @transform_2(%arg0: i32) -> (i32, i32, i32) {
    %c0_i32 = arith.constant 0 : i32
    %c0_i32_0 = arith.constant 0 : i32
    %c0_i32_1 = arith.constant 0 : i32
    return %arg0, %c0_i32, %c0_i32_0 : i32, i32, i32
  }
  func.func @transform_3(%arg0: i32) -> (i32, i32) {
    %c0_i32 = arith.constant 0 : i32
    %c0_i32_0 = arith.constant 0 : i32
    %c0_i32_1 = arith.constant 0 : i32
    return %c0_i32, %c0_i32_0 : i32, i32
  }
  func.func @transform_4(%arg0: i32) -> (i32, i32) {
    %c0_i32 = arith.constant 0 : i32
    %c0_i32_0 = arith.constant 0 : i32
    %c0_i32_1 = arith.constant 0 : i32
    return %c0_i32, %c0_i32_0 : i32, i32
  }
  func.func @transform_5(%arg0: i32) -> (i32, i32) {
    %c0_i32 = arith.constant 0 : i32
    %c0_i32_0 = arith.constant 0 : i32
    %c0_i32_1 = arith.constant 0 : i32
    return %c0_i32, %c0_i32_0 : i32, i32
  }
  func.func @transform_6(%arg0: i32) -> (i32, i32) {
    %c0_i32 = arith.constant 0 : i32
    %c0_i32_0 = arith.constant 0 : i32
    %c0_i32_1 = arith.constant 0 : i32
    return %c0_i32, %c0_i32_0 : i32, i32
  }
  func.func @transform_7(%arg0: i32) -> (i32, i32) {
    %c0_i32 = arith.constant 0 : i32
    %c0_i32_0 = arith.constant 0 : i32
    %c0_i32_1 = arith.constant 0 : i32
    return %c0_i32, %c0_i32_0 : i32, i32
  }
  func.func @transform_8(%arg0: i32) -> (i32, i32) {
    %c0_i32 = arith.constant 0 : i32
    %c0_i32_0 = arith.constant 0 : i32
    %c0_i32_1 = arith.constant 0 : i32
    return %c0_i32, %c0_i32_0 : i32, i32
  }
  func.func @transform_9(%arg0: i32) -> (i32, i32, i32) {
    %c0_i32 = arith.constant 0 : i32
    %c0_i32_0 = arith.constant 0 : i32
    %c0_i32_1 = arith.constant 0 : i32
    return %arg0, %c0_i32, %c0_i32_0 : i32, i32, i32
  }
}

</mosaic_0001>

<bundles_post_ra>
// kernel: graphsage_forward.1
= control target key start
LH: loop header
LB: loop body
LE: loop exit
PB: predicated region body
PF: predicated region fallthrough
CT: control target
= control target key end

     0   :  { %s1101_s30 = smov 0   ;;  %s1205_s0 = inlined_call_operand.vmem [shape: bf16[2,32,64], index: 0, kind: input, shape index: {}]   ;;  %s1206_s1 = inlined_call_operand.vmem [shape: bf16[2,16,32], index: 1, kind: input, shape index: {}]   ;;  %s1207_s2 = inlined_call_operand.vmem [shape: bf16[2,64,16], index: 2, kind: input, shape index: {}]   ;;  %s1208_s3 = inlined_call_operand.vmem [shape: bf16[16,128], index: 3, kind: input, shape index: {}]   ;;  %s1209_s4 = inlined_call_operand.vmem [shape: bf16[16,128], index: 4, kind: input, shape index: {}]   ;;  %s1210_s5 = inlined_call_operand.vmem [shape: f32[1,128], index: 5, kind: input, shape index: {}]   ;;  %s1211_s6 = inlined_call_operand.vmem [shape: bf16[128,128], index: 6, kind: input, shape index: {}]   ;;  %s1212_s7 = inlined_call_operand.vmem [shape: bf16[128,128], index: 7, kind: input, shape index: {}]   ;;  %s1213_s8 = inlined_call_operand.vmem [shape: f32[1,128], index: 8, kind: input, shape index: {}]   ;;  %s1214_s9 = inlined_call_operand.vmem [shape: f32[2,16,128], index: 9, kind: output, shape index: {}]  }
   0x1 LB: > { %s868_s10 = sadd.s32 4294967295, %s1049_s30   ;;  %p872_p0 = scmp.ge.s32.totalorder %s1049_s30, 1  ;;  %s1049_s30 = sphi %s1101_s30, %s19_s30  }
   0x2   : > { %p307_p1 = scmp.lt.s32.totalorder %s1049_s30, 3 }
   0x4   : > { %p308_p2 = pnand %p872_p0, %p307_p1 }
   0x5   : > { %p353_p3 = scmp.lt.s32.totalorder (!%p308_p2), %s868_s10, 1 }
   0x6   : > { %311 = sbr.rel (%p308_p2) target bundleno = 674 (0x2a2), region = 56 }
   0xb   : > { %v1003_v0 = vld [vmem:[%s1208_s3] sm:$0xff]  ;;  %s1216_s10 = smov (!%p353_p3, %s868_s10), 1  ;;  %vm454_vm0 = vcmask 130048   ;;  %vm392_vm1 = vcmask 523264   ;;  %v1012_v30 = vld [vmem:[%s1211_s6 + $0x38] sm:$0xff]  ;;  %v1011_v32 = vld [vmem:[%s1211_s6 + $0x30] sm:$0xff] }
   0xc   : > { %474 = vmatpush.bf16.msra.mxu0 %v1003_v0  ;;  %s994_s13 = sshll.u32 %s1216_s10, 5  ;;  %v1004_v9 = vld [vmem:[%s1209_s4] sm:$0xff]  ;;  %s992_s19 = sshll.u32 %s1216_s10, 4  ;;  %v1020_v31 = vld [vmem:[%s1212_s7 + $0x38] sm:$0xff]  ;;  %658 = vmatpush.bf16.msra.mxu3 %v1012_v30  ;;  %v1019_v33 = vld [vmem:[%s1212_s7 + $0x30] sm:$0xff]  ;;  %vm411_vm2 = vcmask 261120  }
   0xd   : > { %s367_s16 = scalar_lea.vmem %s1207_s2, %s994_s13  ;;  %554 = vmatpush.bf16.msra.mxu2 %v1004_v9  ;;  %s357_s22 = scalar_lea.vmem %s1205_s0, %s992_s19  ;;  %v1010_v34 = vld [vmem:[%s1211_s6 + $0x28] sm:$0xff]  ;;  %v1009_v36 = vld [vmem:[%s1211_s6 + $0x20] sm:$0xff]  ;;  %v1008_v38 = vld [vmem:[%s1211_s6 + $0x18] sm:$0xff] }
   0xe   : > { %v999_v1 = vld [vmem:[%s367_s16] sm:$0xff]  ;;  %v1000_v2 = vld [vmem:[%s367_s16 + $0x8] sm:$0xff]  ;;  %v1001_v3 = vld [vmem:[%s367_s16 + $0x10] sm:$0xff]  ;;  %s993_s21 = sshll.u32 %s1216_s10, 3  ;;  %s372_s29 = scalar_lea.vmem %s1214_s9, %s992_s19 }
   0xf   : > { %901 = vmatmul.msk.bf16.vlgmr.msra.gmra.mxu0 %vm454_vm0, %v999_v1  ;;  %v1002_v4 = vld [vmem:[%s367_s16 + $0x18] sm:$0xff]  ;;  %v374_v11 = vld [vmem:[%s357_s22] sm:$0xff]   ;;  %v376_v18 = vld [vmem:[%s357_s22 + $0x8] sm:$0xff]   ;;  %s362_s24 = scalar_lea.vmem %s1206_s1, %s993_s21 }
  0x10   : > { %919 = vmatmul.msk.bf16.vlgmr.msra.gmra.mxu2 %vm454_vm0, %v999_v1  ;;  %v388_v13 = vunpack.c.l.bf16 %v374_v11  ;;  %v389_v15 = vunpack.c.h.bf16 %v374_v11  ;;  %v390_v20 = vunpack.c.l.bf16 %v376_v18  ;;  %v391_v23 = vunpack.c.h.bf16 %v376_v18  ;;  %v996_v28 = vld [vmem:[%s357_s22] sm:$0xff]  ;;  %v997_v29 = vld [vmem:[%s357_s22 + $0x8] sm:$0xff]  ;;  %659 = vmatpush.bf16.msra.mxu3 %v1011_v32  ;;  %v1016_v39 = vld [vmem:[%s1212_s7 + $0x18] sm:$0xff] }
  0x11   : > { %v1018_v35 = vld [vmem:[%s1212_s7 + $0x28] sm:$0xff]  ;;  %v1017_v37 = vld [vmem:[%s1212_s7 + $0x20] sm:$0xff]  ;;  %v1007_v40 = vld [vmem:[%s1211_s6 + $0x10] sm:$0xff] }
  0x12   : > { %v393_v14 = vsel %vm392_vm1, %v388_v13, 0.0  ;;  %v396_v17 = vsel %vm392_vm1, %v389_v15, 0.0  ;;  %v399_v22 = vsel %vm392_vm1, %v390_v20, 0.0  ;;  %v402_v25 = vsel %vm392_vm1, %v391_v23, 0.0  ;;  %v1015_v41 = vld [vmem:[%s1212_s7 + $0x10] sm:$0xff]  ;;  %v1006_v42 = vld [vmem:[%s1211_s6 + $0x8] sm:$0xff] }
  0x13   : > { %394 = vadd.xlane.f32.xlu0 %v393_v14  ;;  %400 = vadd.xlane.f32.xlu1 %v399_v22  ;;  %v1014_v43 = vld [vmem:[%s1212_s7 + $0x8] sm:$0xff]  ;;  %v1005_v45 = vld [vmem:[%s1211_s6] sm:$0xff] }
  0x14   : > { %660 = vmatpush.bf16.msra.mxu3 %v1010_v34  ;;  %v1013_v46 = vld [vmem:[%s1212_s7] sm:$0xff] }
  0x15   : > { %v1029_v56 = vld [vmem:[%s1210_s5] ss:$0 sm:$0xff] }
  0x16   : > { %v378_v30 = vld [vmem:[%s362_s24] sm:$0xff]  }
  0x18   : > { %661 = vmatpush.bf16.msra.mxu3 %v1009_v36 }
  0x1b   : > { %397 = vadd.xlane.f32.xlu0 %v396_v17  ;;  %403 = vadd.xlane.f32.xlu1 %v402_v25 }
  0x1c   : > { %662 = vmatpush.bf16.msra.mxu3 %v1008_v38 }
  0x1f   : > { %902 = vmatmul.msk.bf16.gmra.mxu0 %vm454_vm0, %v1000_v2 }
  0x20   : > { %920 = vmatmul.msk.bf16.gmra.mxu2 %vm454_vm0, %v1000_v2  ;;  %663 = vmatpush.bf16.msra.mxu3 %v1007_v40  ;;  %v998_v40 = vld [vmem:[%s362_s24] sm:$0xff] }
  0x24   : > { %664 = vmatpush.bf16.msra.mxu3 %v1006_v42 }
  0x28   : > { %665 = vmatpush.bf16.msra.mxu3 %v1005_v45 }
  0x2f   : > { %903 = vmatmul.msk.bf16.gmra.mxu0 %vm454_vm0, %v1001_v3 }
  0x3f   : > { %904 = vmatmul.msk.bf16.gmra.mxu0 %vm454_vm0, %v1002_v4 }
  0x86   : > { %v395_v44 = vpop.xlane.xlu0 %394  ;;  %v401_v52 = vpop.xlane.xlu1 %400 }
  0x87   : > { %v405_v47 = vmax.f32 %v395_v44, 1.0  ;;  %v407_v57 = vmax.f32 %v401_v52, 1.0 }
  0x89   : > { %1031 = vrcp.f32 %v405_v47 }
  0x8c   : > { %v476_v5 = vpop.f32.mrf.mxu0 }
  0x8e   : > { %v398_v48 = vpop.xlane.xlu0 %397  ;;  %v404_v63 = vpop.xlane.xlu1 %403 }
  0x8f   : > { %v406_v50 = vmax.f32 %v398_v48, 1.0  ;;  %v1032_v51 = vpop.eup %1031  ;;  %v408_v2 = vmax.f32 %v404_v63, 1.0 }
  0x91   : > { %1033 = vrcp.f32 %v406_v50 }
  0x92   : > { %1035 = vrcp.f32 %v407_v57 }
  0x93   : > { %v556_v49 = vpop.f32.mrf.mxu2  ;;  %1037 = vrcp.f32 %v408_v2 }
  0x94   : > { %v478_v6 = vpop.f32.mrf.mxu0 }
  0x95   : > { %v498_v27 = vpack.c.bf16 %v478_v6, %v476_v5 }
  0x97   : > { %v1034_v58 = vpop.eup %1033 }
  0x98   : > { %v1036_v4 = vpop.eup %1035 }
  0x99   : > { %v1038_v15 = vpop.eup %1037 }
  0x9b   : > { %v558_v59 = vpop.f32.mrf.mxu2 }
  0x9c   : > { %v481_v7 = vpop.f32.mrf.mxu0 }
  0xa4   : > { %v483_v8 = vpop.f32.mrf.mxu0 }
  0xa5   : > { %v499_v26 = vpack.c.bf16 %v483_v8, %v481_v7  ;;  %v561_v7 = vpop.f32.mrf.mxu2 }
  0xac   : > { %v486_v10 = vpop.f32.mrf.mxu0 }
  0xb4   : > { %v488_v12 = vpop.f32.mrf.mxu0 }
  0xb5   : > { %v500_v24 = vpack.c.bf16 %v488_v12, %v486_v10 }
  0xbc   : > { %v491_v16 = vpop.f32.mrf.mxu0 }
  0xc4   : > { %v493_v19 = vpop.f32.mrf.mxu0 }
  0xc5   : > { %v501_v21 = vpack.c.bf16 %v493_v19, %v491_v16  ;;  %v563_v19 = vpop.f32.mrf.mxu2 }
  0xc7   : > { %522 = vmatpush.bf16.msra.mxu1 %v501_v21 }
  0xcb   : > { %523 = vmatpush.bf16.msra.mxu1 %v500_v24 }
  0xcf   : > { %524 = vmatpush.bf16.msra.mxu1 %v499_v26 }
  0xd3   : > { %525 = vmatpush.bf16.msra.mxu1 %v498_v27 }
  0xd6   : > { %913 = vmatmul.msk.bf16.vlgmr.msra.gmra.mxu1 %vm392_vm1, %v996_v28 }
  0xd7   : > { %767 = vmatpush.bf16.msrb.mxu1 %v1020_v31  ;;  %v409_v31 = vunpack.c.l.bf16 %v378_v30 }
  0xd9   : > { %v412_v32 = vsel %vm411_vm2, %v409_v31, 0.0 }
  0xda   : > { %413 = vadd.xlane.f32.xlu2 %v412_v32 }
  0xdb   : > { %768 = vmatpush.bf16.msrb.mxu1 %v1019_v33  ;;  %v410_v33 = vunpack.c.h.bf16 %v378_v30 }
  0xdf   : > { %769 = vmatpush.bf16.msrb.mxu1 %v1018_v35  ;;  %v415_v35 = vsel %vm411_vm2, %v410_v33, 0.0 }
  0xe2   : > { %416 = vadd.xlane.f32.xlu2 %v415_v35 }
  0xe3   : > { %770 = vmatpush.bf16.msrb.mxu1 %v1017_v37 }
  0xe6   : > { %914 = vmatmul.msk.bf16.gmra.mxu1 %vm392_vm1, %v997_v29 }
  0xe7   : > { %771 = vmatpush.bf16.msrb.mxu1 %v1016_v39 }
  0xeb   : > { %772 = vmatpush.bf16.msrb.mxu1 %v1015_v41 }
  0xef   : > { %773 = vmatpush.bf16.msrb.mxu1 %v1014_v43 }
  0xf3   : > { %774 = vmatpush.bf16.msrb.mxu1 %v1013_v46 }
 0x14d   : > { %v414_v41 = vpop.xlane.xlu2 %413 }
 0x14e   : > { %v418_v42 = vmax.f32 %v414_v41, 1.0 }
 0x150   : > { %1039 = vrcp.f32 %v418_v42 }
 0x153   : > { %v527_v53 = vpop.f32.mrf.mxu1 }
 0x154   : > { %v537_v54 = vmul.f32 %v1032_v51, %v527_v53 }
 0x155   : > { %v417_v43 = vpop.xlane.xlu2 %416 }
 0x156   : > { %v557_v55 = vadd.f32 %v556_v49, %v537_v54  ;;  %v419_v44 = vmax.f32 %v417_v43, 1.0  ;;  %v1040_v45 = vpop.eup %1039  ;;  %v1030_v49 = vld [vmem:[%s1213_s8] ss:$0 sm:$0xff] }
 0x158   : > { %v570_v60 = vadd.f32 %v1029_v56, %v557_v55  ;;  %1041 = vrcp.f32 %v419_v44 }
 0x15a   : > { %v574_v1 = vmax.f32 %v570_v60, 0.0 }
 0x15b   : > { %v529_v61 = vpop.f32.mrf.mxu1 }
 0x15c   : > { %v538_v62 = vmul.f32 %v1034_v58, %v529_v61  ;;  %v578_v6 = vpack.c.bf16 %v574_v1, %v574_v1 }
 0x15e   : > { %v559_v0 = vadd.f32 %v558_v59, %v538_v62  ;;  %v602_v12 = vunpack.c.l.b16 %v578_v6  ;;  %v1042_v52 = vpop.eup %1041 }
 0x160   : > { %v571_v3 = vadd.f32 %v1029_v56, %v559_v0 }
 0x162   : > { %v575_v5 = vmax.f32 %v571_v3, 0.0 }
 0x163   : > { %v532_v8 = vpop.f32.mrf.mxu1 }
 0x164   : > { %v539_v9 = vmul.f32 %v1036_v4, %v532_v8  ;;  %v579_v10 = vpack.c.bf16 %v575_v5, %v575_v5 }
 0x166   : > { %v562_v11 = vadd.f32 %v561_v7, %v539_v9  ;;  %v603_v13 = vunpack.c.l.b16 %v579_v10 }
 0x168   : > { %v606_v14 = vpack.c.b16 %v603_v13, %v602_v12  ;;  %v572_v16 = vadd.f32 %v1029_v56, %v562_v11 }
 0x16a   : > { %666 = vmatmul.bf16.vlgmr.msra.gmra.mxu3 %v606_v14  ;;  %775 = vmatmul.bf16.vlgmr.msrb.gmra.mxu1 %v606_v14  ;;  %v576_v21 = vmax.f32 %v572_v16, 0.0 }
 0x16b   : > { %v534_v17 = vpop.f32.mrf.mxu1 }
 0x16c   : > { %v540_v18 = vmul.f32 %v1038_v15, %v534_v17  ;;  %v580_v24 = vpack.c.bf16 %v576_v21, %v576_v21 }
 0x16e   : > { %v564_v20 = vadd.f32 %v563_v19, %v540_v18  ;;  %v604_v26 = vunpack.c.l.b16 %v580_v24 }
 0x170   : > { %v573_v22 = vadd.f32 %v1029_v56, %v564_v20 }
 0x172   : > { %v577_v23 = vmax.f32 %v573_v22, 0.0 }
 0x174   : > { %v581_v25 = vpack.c.bf16 %v577_v23, %v577_v23 }
 0x176   : > { %v605_v27 = vunpack.c.l.b16 %v581_v25 }
 0x178   : > { %v607_v28 = vpack.c.b16 %v605_v27, %v604_v26 }
 0x17a   : > { %671 = vmatmul.bf16.gmra.mxu3 %v607_v28 }
 0x1e7   : > { %v776_v46 = vpop.f32.mrf.mxu1 }
 0x1ed   : > { %v667_v29 = vpop.f32.mrf.mxu3 }
 0x1ef   : > { %v778_v55 = vpop.f32.mrf.mxu1 }
 0x1f5   : > { %v669_v34 = vpop.f32.mrf.mxu3 }
 0x1f6   : > { %v693_v39 = vpack.c.bf16 %v669_v34, %v667_v29 }
 0x1fd   : > { %v672_v36 = vpop.f32.mrf.mxu3 }
 0x205   : > { %v674_v37 = vpop.f32.mrf.mxu3 }
 0x206   : > { %v694_v38 = vpack.c.bf16 %v674_v37, %v672_v36 }
 0x208   : > { %709 = vmatpush.bf16.msrb.mxu2 %v694_v38 }
 0x20c   : > { %710 = vmatpush.bf16.msrb.mxu2 %v693_v39 }
 0x20f   : > { %957 = vmatmul.msk.bf16.vlgmr.msrb.gmra.mxu2 %vm411_vm2, %v998_v40 }
 0x292   : > { %v712_v47 = vpop.f32.mrf.mxu2 }
 0x293   : > { %v717_v48 = vmul.f32 %v1040_v45, %v712_v47 }
 0x295   : > { %v777_v50 = vadd.f32 %v776_v46, %v717_v48 }
 0x297   : > { %v785_v51 = vadd.f32 %v1030_v49, %v777_v50 }
 0x299   : > { %787 = vst [vmem:[%s372_s29] sm:$0xff] %v785_v51 }
 0x29a   : > { %v714_v53 = vpop.f32.mrf.mxu2 }
 0x29b   : > { %v718_v54 = vmul.f32 %v1042_v52, %v714_v53 }
 0x29d   : > { %v779_v56 = vadd.f32 %v778_v55, %v718_v54 }
 0x29f   : > { %v786_v57 = vadd.f32 %v1030_v49, %v779_v56 }
 0x2a1   : > { %788 = vst [vmem:[%s372_s29 + $0x8] sm:$0xff] %v786_v57 }
 0x2a2 PF: > { %s19_s30 = sadd.s32 1, %s1049_s30  }
 0x2a3   : > { %p16_p4 = scmp.ge.s32.totalorder %s19_s30, 4  }
 0x2a5   :  { %18 = sbr.rel (!%p16_p4) target bundleno = 1 (0x1), region = 92 }

</bundles_post_ra>
